<compile_context>
chip_gen: v7x
topology: tpu7x:2x2x1
jax: 0.10.0
libtpu: 0.0.40
codegen_flags: <defaults>
</compile_context>

<pallas_src>
import numpy as np
import jax
import jax.numpy as jnp
from jax.experimental import pallas as pl
from jax.experimental.pallas import tpu as pltpu

# ---------------- configuration (small shapes implied by the module) --------
BATCH = 2
SEQ = 64                     # tokens per batch element
IN_FEATURES = 128            # lane-dense channel dim
HIDDEN_FEATURES = 256        # mlp_ratio = 2
TM_MAX = 256                 # max row tile (tokens) per grid step


# ============================ Pallas kernel =================================
def _mlp_kernel(x_ref, w1_ref, b1_ref, w2_ref, b2_ref, o_ref):
    # x_ref: (TM, C_in) bf16   w1_ref: (C_in, Hd) bf16   b1_ref: (1, Hd) f32
    # w2_ref: (Hd, C_out) bf16 b2_ref: (1, C_out) f32    o_ref: (TM, C_out) f32
    x = x_ref[...]

    # fc1 (bf16 MXU inputs, f32 accumulation) + f32 bias
    h = jnp.dot(x, w1_ref[...], preferred_element_type=jnp.float32) + b1_ref[...]

    # GELU in f32 on the EUP path (tanh form co-issues with MXU/VALU work).
    h = jax.nn.gelu(h, approximate=True)

    # fc2: downcast the activation only at the matmul input (native MXU dtype,
    # halves the live (TM, Hd) intermediate), f32 accumulation + f32 bias.
    y = jnp.dot(h.astype(jnp.bfloat16), w2_ref[...],
                preferred_element_type=jnp.float32) + b2_ref[...]

    # nn.Dropout(drop=0.0) is an identity in the forward pass -> omitted.
    o_ref[...] = y.astype(o_ref.dtype)


# ============================ wrapper =======================================
def _pick_tm(m, tm_max=TM_MAX):
    """Largest sublane-aligned row tile that still gives >=2 grid steps."""
    tm = min(tm_max, m)
    if m > 8 and pl.cdiv(m, tm) < 2:
        half = max(8, ((m // 2) + 7) // 8 * 8)   # round to sublane multiple
        tm = min(tm, half)
    return tm


def mlp_pallas(x, params):
    """x: (B, L, C_in) -> (B, L, C_out).  Fused fc1 -> GELU -> fc2."""
    b, l, c_in = x.shape
    hid = params["w1_t"].shape[1]
    c_out = params["w2_t"].shape[1]
    m = b * l

    # Lane-dense token slab, bf16 operands for the MXU.
    x2 = x.reshape(m, c_in).astype(jnp.bfloat16)
    w1 = params["w1_t"].astype(jnp.bfloat16)
    w2 = params["w2_t"].astype(jnp.bfloat16)
    b1 = params["b1"]                              # f32 (added after accum)
    b2 = params["b2"]

    tm = _pick_tm(m)
    grid = (pl.cdiv(m, tm),)

    # VMEM budget: 2x-buffered x/out tiles, single-buffered weights, f32 h.
    tile_bytes = (2 * tm * c_in * 2            # bf16 x tile, double-buffered
                  + 2 * tm * c_out * 4         # f32 out tile, double-buffered
                  + (c_in * hid + hid * c_out) * 2   # bf16 weights, 1 buffer
                  + (hid + c_out) * 4          # biases
                  + tm * hid * 4)              # f32 intermediate h
    vmem_limit = int(min(max(2 * tile_bytes, 16 * 1024 * 1024),
                         48 * 1024 * 1024))

    cost = pl.CostEstimate(
        flops=2 * m * (c_in * hid + hid * c_out),
        transcendentals=m * hid,               # tanh in the GELU
        bytes_accessed=(x2.size * 2 + w1.size * 2 + w2.size * 2
                        + b1.size * 4 + b2.size * 4 + m * c_out * 4),
    )

    out = pl.pallas_call(
        _mlp_kernel,
        out_shape=jax.ShapeDtypeStruct((m, c_out), jnp.float32),
        grid=grid,
        in_specs=[
            pl.BlockSpec((tm, c_in), lambda i: (i, 0)),          # x rows
            pl.BlockSpec((c_in, hid), lambda i: (0, 0),
                         pipeline_mode=pl.Buffered(1)),          # w1 resident
            pl.BlockSpec((1, hid), lambda i: (0, 0),
                         pipeline_mode=pl.Buffered(1)),          # b1
            pl.BlockSpec((hid, c_out), lambda i: (0, 0),
                         pipeline_mode=pl.Buffered(1)),          # w2 resident
            pl.BlockSpec((1, c_out), lambda i: (0, 0),
                         pipeline_mode=pl.Buffered(1)),          # b2
        ],
        out_specs=pl.BlockSpec((tm, c_out), lambda i: (i, 0)),
        compiler_params=pltpu.CompilerParams(
            dimension_semantics=("parallel",),                   # megacore
            vmem_limit_bytes=vmem_limit),
        cost_estimate=cost,
    )(x2, w1, b1, w2, b2)

    return out.reshape(b, l, c_out)


# ============================ parameters (match nn.Linear init) =============
def make_mlp_params(key, in_features, hidden_features, out_features):
    ks = jax.random.split(key, 4)

    def unif(k, shape, fan_in):
        bound = 1.0 / np.sqrt(fan_in)
        return jax.random.uniform(k, shape, jnp.float32, -bound, bound)

    # torch weights are (out, in); store pre-transposed for row-major matmul.
    w1 = unif(ks[0], (hidden_features, in_features), in_features)
    b1 = unif(ks[1], (hidden_features,), in_features)
    w2 = unif(ks[2], (out_features, hidden_features), hidden_features)
    b2 = unif(ks[3], (out_features,), hidden_features)

    return dict(
        w1_t=w1.T,                    # (C_in, Hd)
        b1=b1[None, :],               # (1, Hd)
        w2_t=w2.T,                    # (Hd, C_out)
        b2=b2[None, :],               # (1, C_out)
    )


# ============================ pure-JAX reference ============================
def mlp_ref(x, params):
    h = x @ params["w1_t"] + params["b1"][0]
    h = jax.nn.gelu(h, approximate=False)
    return h @ params["w2_t"] + params["b2"][0]


# ============================ main ==========================================
if __name__ == "__main__":
    key = jax.random.PRNGKey(0)
    kx, kp = jax.random.split(key)

    x = jax.random.normal(kx, (BATCH, SEQ, IN_FEATURES), jnp.float32)
    params = make_mlp_params(kp, IN_FEATURES, HIDDEN_FEATURES, IN_FEATURES)

    out = jax.block_until_ready(mlp_pallas(x, params))

    with jax.default_matmul_precision("highest"):
        ref = jax.block_until_ready(mlp_ref(x, params))

    assert out.shape == (BATCH, SEQ, IN_FEATURES)
    np.testing.assert_allclose(np.asarray(out), np.asarray(ref),
                               atol=1e-2, rtol=1e-2)
    print("KERNEL_OK")
</pallas_src>

<mosaic_0001>
module attributes {stable_mosaic.version = 11 : i64} {
  func.func @_mlp_kernel(%arg0: i32, %arg1: memref<64x128xbf16, #tpu.memory_space<vmem>>, %arg2: memref<128x256xbf16, #tpu.memory_space<vmem>>, %arg3: memref<1x256xf32, #tpu.memory_space<vmem>>, %arg4: memref<256x128xbf16, #tpu.memory_space<vmem>>, %arg5: memref<1x128xf32, #tpu.memory_space<vmem>>, %arg6: memref<64x128xf32, #tpu.memory_space<vmem>>) attributes {dimension_semantics = [#tpu.dimension_semantics<parallel>], iteration_bounds = array<i64: 2>, scalar_prefetch = 0 : i64, scratch_operands = 0 : i64, tpu.core_type = #tpu.core_type<tc>, window_params = [{transform_indices = @transform_0, window_bounds = array<i64: 64, 128>}, {pipeline_mode = #tpu.pipeline_mode<synchronous>, transform_indices = @transform_1, window_bounds = array<i64: 128, 256>}, {pipeline_mode = #tpu.pipeline_mode<synchronous>, transform_indices = @transform_2, window_bounds = array<i64: 1, 256>}, {pipeline_mode = #tpu.pipeline_mode<synchronous>, transform_indices = @transform_3, window_bounds = array<i64: 256, 128>}, {pipeline_mode = #tpu.pipeline_mode<synchronous>, transform_indices = @transform_4, window_bounds = array<i64: 1, 128>}, {transform_indices = @transform_5, window_bounds = array<i64: 64, 128>}]} {
    %c0 = arith.constant 0 : index
    %c0_0 = arith.constant 0 : index
    %0 = vector.load %arg1[%c0, %c0_0] : memref<64x128xbf16, #tpu.memory_space<vmem>>, vector<64x128xbf16>
    %c0_1 = arith.constant 0 : index
    %c0_2 = arith.constant 0 : index
    %1 = vector.load %arg2[%c0_1, %c0_2] : memref<128x256xbf16, #tpu.memory_space<vmem>>, vector<128x256xbf16>
    %cst = arith.constant dense<0.000000e+00> : vector<64x256xf32>
    %2 = tpu.matmul %0, %1, %cst {dimension_numbers = #tpu.dot_dimension_numbers<[1], [0], [0], [1], [0, 0, 1, 1], [], []>} : vector<64x128xbf16>, vector<128x256xbf16>, vector<64x256xf32> -> vector<64x256xf32>
    %c0_3 = arith.constant 0 : index
    %c0_4 = arith.constant 0 : index
    %3 = vector.load %arg3[%c0_3, %c0_4] : memref<1x256xf32, #tpu.memory_space<vmem>>, vector<1x256xf32>
    %4 = vector.broadcast %3 : vector<1x256xf32> to vector<64x256xf32>
    %5 = arith.addf %2, %4 : vector<64x256xf32>
    %6 = arith.mulf %5, %5 : vector<64x256xf32>
    %7 = arith.mulf %5, %6 : vector<64x256xf32>
    %cst_5 = arith.constant 4.471500e-02 : f32
    %8 = vector.broadcast %cst_5 : f32 to vector<64x256xf32>
    %9 = arith.mulf %8, %7 : vector<64x256xf32>
    %10 = arith.addf %5, %9 : vector<64x256xf32>
    %cst_6 = arith.constant 0.797884583 : f32
    %11 = vector.broadcast %cst_6 : f32 to vector<64x256xf32>
    %12 = arith.mulf %11, %10 : vector<64x256xf32>
    %13 = math.tanh %12 : vector<64x256xf32>
    %cst_7 = arith.constant 1.000000e+00 : f32
    %14 = vector.broadcast %cst_7 : f32 to vector<64x256xf32>
    %15 = arith.addf %14, %13 : vector<64x256xf32>
    %cst_8 = arith.constant 5.000000e-01 : f32
    %16 = vector.broadcast %cst_8 : f32 to vector<64x256xf32>
    %17 = arith.mulf %16, %15 : vector<64x256xf32>
    %18 = arith.mulf %5, %17 : vector<64x256xf32>
    %19 = arith.truncf %18 : vector<64x256xf32> to vector<64x256xbf16>
    %c0_9 = arith.constant 0 : index
    %c0_10 = arith.constant 0 : index
    %20 = vector.load %arg4[%c0_9, %c0_10] : memref<256x128xbf16, #tpu.memory_space<vmem>>, vector<256x128xbf16>
    %cst_11 = arith.constant dense<0.000000e+00> : vector<64x128xf32>
    %21 = tpu.matmul %19, %20, %cst_11 {dimension_numbers = #tpu.dot_dimension_numbers<[1], [0], [0], [1], [0, 0, 1, 1], [], []>} : vector<64x256xbf16>, vector<256x128xbf16>, vector<64x128xf32> -> vector<64x128xf32>
    %c0_12 = arith.constant 0 : index
    %c0_13 = arith.constant 0 : index
    %22 = vector.load %arg5[%c0_12, %c0_13] : memref<1x128xf32, #tpu.memory_space<vmem>>, vector<1x128xf32>
    %23 = vector.broadcast %22 : vector<1x128xf32> to vector<64x128xf32>
    %24 = arith.addf %21, %23 : vector<64x128xf32>
    %c0_14 = arith.constant 0 : index
    %c0_15 = arith.constant 0 : index
    %25 = vector.load %arg6[%c0_14, %c0_15] : memref<64x128xf32, #tpu.memory_space<vmem>>, vector<64x128xf32>
    tpu.vector_store %arg6[%c0_14, %c0_15], %24 {strides = array<i32>} : memref<64x128xf32, #tpu.memory_space<vmem>>, vector<64x128xf32>,
    return
  }
  func.func @transform_0(%arg0: i32) -> (i32, i32) {
    %c0_i32 = arith.constant 0 : i32
    %c0_i32_0 = arith.constant 0 : i32
    return %arg0, %c0_i32 : i32, i32
  }
  func.func @transform_1(%arg0: i32) -> (i32, i32) {
    %c0_i32 = arith.constant 0 : i32
    %c0_i32_0 = arith.constant 0 : i32
    %c0_i32_1 = arith.constant 0 : i32
    return %c0_i32, %c0_i32_0 : i32, i32
  }
  func.func @transform_2(%arg0: i32) -> (i32, i32) {
    %c0_i32 = arith.constant 0 : i32
    %c0_i32_0 = arith.constant 0 : i32
    %c0_i32_1 = arith.constant 0 : i32
    return %c0_i32, %c0_i32_0 : i32, i32
  }
  func.func @transform_3(%arg0: i32) -> (i32, i32) {
    %c0_i32 = arith.constant 0 : i32
    %c0_i32_0 = arith.constant 0 : i32
    %c0_i32_1 = arith.constant 0 : i32
    return %c0_i32, %c0_i32_0 : i32, i32
  }
  func.func @transform_4(%arg0: i32) -> (i32, i32) {
    %c0_i32 = arith.constant 0 : i32
    %c0_i32_0 = arith.constant 0 : i32
    %c0_i32_1 = arith.constant 0 : i32
    return %c0_i32, %c0_i32_0 : i32, i32
  }
  func.func @transform_5(%arg0: i32) -> (i32, i32) {
    %c0_i32 = arith.constant 0 : i32
    %c0_i32_0 = arith.constant 0 : i32
    return %arg0, %c0_i32 : i32, i32
  }
}

</mosaic_0001>

<bundles_post_ra>
// kernel: tpu_custom_call.1
= control target key start
LH: loop header
LB: loop body
LE: loop exit
PB: predicated region body
PF: predicated region fallthrough
CT: control target
= control target key end

     0   :  { %10 = vsyncpa [#allocation3], 0  ;;  %s1796_s0 = inlined_call_operand.hbm [shape: bf16[128,128], index: 0, kind: input, shape index: {}]   ;;  %s1797_s1 = inlined_call_operand.hbm [shape: bf16[128,256], index: 1, kind: input, shape index: {}]   ;;  %s1798_s2 = inlined_call_operand.vmem [shape: f32[1,256], index: 2, kind: input, shape index: {}]   ;;  %s1799_s3 = inlined_call_operand.hbm [shape: bf16[256,128], index: 3, kind: input, shape index: {}]   ;;  %s1800_s4 = inlined_call_operand.vmem [shape: f32[1,128], index: 4, kind: input, shape index: {}]   ;;  %s1801_s5 = inlined_call_operand.hbm [shape: f32[128,128], index: 5, kind: output, shape index: {}]  }
   0x1   :  { %12 = vsyncpa [#allocation3 + $0x1], 0 }
   0x2   :  { %13 = vsyncpa [#allocation6], 0 }
   0x3   :  { %14 = vsyncpa [#allocation4], 0 }
   0x4   :  { %16 = vsyncpa [#allocation4 + $0x1], 0  ;;  %s1400_s18 = smov 0   ;;  %s1402_s19 = smov 0  }
   0x5   :  { %s1404_s20 = smov 0   ;;  %s1406_s21 = smov 0  }
   0x6 LB: > { %s1421_s22 = sadd.s32 4294967295, %s1357_s21   ;;  %s954_s23 = sadd.s32 4294967294, %s1357_s21   ;;  %s1357_s21 = sphi %s1406_s21, %s1821_s21   ;;  %s1353_s20 = sphi %s1404_s20, %s1820_s20   ;;  %s1349_s19 = sphi %s1402_s19, %s1819_s19   ;;  %s1345_s18 = sphi %s1400_s18, %s1818_s18  }
   0x7   : > { %p42_p0 = scmp.ne.s32.totalorder %s1349_s19, %s1345_s18  ;;  %p1802_p1 = scmp.eq.s32.totalorder %s1421_s22, 0 }
   0x8   : > { %p156_p3 = scmp.eq.s32.totalorder %s954_s23, 1  ;;  %p955_p5 = scmp.ge.s32.totalorder %s1357_s21, 1 }
   0x9   : > { %p1430_p4 = por %p1802_p1, %p42_p0  ;;  %p163_p7 = scmp.lt.s32.totalorder %s1357_s21, 3 }
   0xa   : > { %p1435_p6 = por %p156_p3, %p42_p0  ;;  %s1359_s27 = smov [#allocation5]  }
   0xb   : > { %s1805_s24 = scalar_select %p1430_p4, 1, 0 }
   0xc   : > { %s1806_s25 = scalar_select %p1435_p6, 1, 0 }
   0xd   : > { %p1440_p8 = pnand %p955_p5, %p163_p7  ;;  %s175_s28 = sshll.u32 %s1359_s27, 4  ;;  %s1444_s28 = int_to_ptr.vmem [resolvable:$true] %s175_s28 }
   0xe   : > { %s1360_s30 = smov [#allocation7]   ;;  %s1201_s9 = scalar_lea.hbm %s1797_s1, 2048 }
   0xf   : > { %p1063_p9 = pneg %p1440_p8  ;;  %s191_s6 = sshll.u32 %s1360_s30, 4  ;;  %s1455_s6 = int_to_ptr.vmem [resolvable:$true] %s191_s6 }
  0x10   : > { %p1202_p12 = scmp.ne.s32.totalorder %s1797_s1, %s1201_s9  ;;  %p1208_p5 = scmp.lt.u32.totalorder %s1201_s9, %s1797_s1 }
  0x11   : > { %p1451_p11 = pnand %p1063_p9, %p1802_p1 }
  0x13   : > { %p1203_p13 = pneg %p1451_p11 }
  0x15   : > { %p1204_p0 = pnand %p1203_p13, %p1202_p12 }
  0x17   : > { %p1205_p3 = pneg %p1204_p0 }
  0x19   : > { %p1210_p7 = pnand %p1208_p5, %p1205_p3 }
  0x1b   : > { %1213 = shalt.err (!%p1210_p7)
}
  0x1c   : > { %s1214_s14 = scalar_lea.vmem %s1444_s28, 2048  ;;  %p1222_p2 = scmp.lt.s32.totalorder %s1444_s28, %s1444_s28 }
  0x1d   : > { %p1215_p9 = scmp.ne.s32.totalorder %s1444_s28, %s1214_s14  ;;  %p1223_p12 = scmp.lt.s32.totalorder %s1214_s14, %s1214_s14 }
  0x1f   : > { %p1217_p10 = pnand %p1215_p9, %p1203_p13  ;;  %p1224_p0 = por %p1223_p12, %p1222_p2 }
  0x21   : > { %p1218_p1 = pneg %p1217_p10 }
  0x23   : > { %p1225_p6 = pnand %p1224_p0, %p1218_p1 }
  0x25   : > { %1228 = shalt.err (!%p1225_p6)
}
  0x26   : > { %s1361_s15 = smov 128   ;;  %s1362_s16 = smov 8  }
  0x27   : > { %1066 = dma.hbm_to_vmem [thread:$0]  (!%p1451_p11), %s1797_s1, 2048, %s1444_s28, [#allocation6], %s1361_s15, %s1361_s15, %s1362_s16  }
  0x28   : > { %s1229_s7 = scalar_lea.hbm %s1799_s3, 2048 }
  0x29   : > { %p1230_p2 = scmp.ne.s32.totalorder %s1799_s3, %s1229_s7  ;;  %p1236_p10 = scmp.lt.u32.totalorder %s1229_s7, %s1799_s3 }
  0x2b   : > { %p1232_p1 = pnand %p1230_p2, %p1203_p13 }
  0x2d   : > { %p1233_p6 = pneg %p1232_p1 }
  0x2f   : > { %p1238_p3 = pnand %p1236_p10, %p1233_p6 }
  0x31   : > { %1241 = shalt.err (!%p1238_p3)
}
  0x32   : > { %s1242_s28 = scalar_lea.vmem %s1455_s6, 2048  ;;  %p1250_p12 = scmp.lt.s32.totalorder %s1455_s6, %s1455_s6 }
  0x33   : > { %p1243_p5 = scmp.ne.s32.totalorder %s1455_s6, %s1242_s28  ;;  %p1251_p0 = scmp.lt.s32.totalorder %s1242_s28, %s1242_s28 }
  0x35   : > { %p1245_p7 = pnand %p1243_p5, %p1203_p13  ;;  %p1252_p2 = por %p1251_p0, %p1250_p12 }
  0x37   : > { %p1246_p9 = pneg %p1245_p7 }
  0x39   : > { %p1253_p1 = pnand %p1252_p2, %p1246_p9 }
  0x3b   : > { %1256 = shalt.err (!%p1253_p1)
}
  0x3c   : > { %s1363_s12 = smov 64   ;;  %s1364_s13 = smov 4  }
  0x3d   : > { %1069 = dma.hbm_to_vmem [thread:$0]  (!%p1451_p11), %s1799_s3, 2048, %s1455_s6, [#allocation6], %s1363_s12, %s1363_s12, %s1364_s13  }
  0x3e   : > { %s1513_s16 = sadd.s32 1, %s1357_s21   ;;  %s29_s23 = sadd.s32 1, %s1353_s20 }
  0x3f   : > { %s26_s17 = ssub.s32 %s1357_s21, %s1513_s16  ;;  %p36_p6 = scmp.ne.s32.totalorder %s1353_s20, %s1349_s19 }
  0x40   : > { %p27_p13 = scmp.eq.s32.totalorder %s26_s17, 0  ;;  %p37_p10 = scmp.eq.s32.totalorder %s1357_s21, 0 }
  0x41   : > { %p1809_p5 = scmp.eq.s32.totalorder %s1421_s22, 1  ;;  %p1080_p9 = scmp.lt.s32.totalorder %s1357_s21, 2 }
  0x42   : > { %s1522_s27 = scalar_select %p27_p13, %s1353_s20, %s29_s23  }
  0x43   : > { %p38_p3 = por %p37_p10, %p36_p6  ;;  %p1526_p7 = por %p1809_p5, %p36_p6 }
  0x44   : > { %s208_s30 = sand.u32 1, %s1353_s20   ;;  %s1009_s6 = sshll.u32 %s1357_s21, 9 }
  0x45   : > { %s1810_s29 = scalar_select %p1526_p7, 1, 0 }
  0x46   : > { %s959_s7 = sshll.u32 %s208_s30, 5  ;;  %s1536_s10 = scalar_lea.hbm %s1796_s0, %s1009_s6 }
  0x47   : > { %s212_s11 = scalar_lea.vmem [#allocation2], %s959_s7  ;;  %p1540_p11 = pnand %p1080_p9, %p38_p3 }
  0x48   : > { %s219_s28 = sshll.u32 %s212_s11, 4  ;;  %s1544_s15 = scalar_lea.sflag [#allocation3], %s208_s30  ;;  %s1538_s28 = int_to_ptr.vmem [resolvable:$true] %s219_s28 }
  0x49   : > { %s1257_s17 = scalar_lea.hbm %s1536_s10, 512  ;;  %p1259_p0 = pneg %p1540_p11 }
  0x4a   : > { %p1258_p12 = scmp.ne.s32.totalorder %s1536_s10, %s1257_s17  ;;  %s1262_s6 = scalar_lea.hbm %s1796_s0, 1024 }
  0x4b   : > { %p1263_p13 = scmp.lt.u32.totalorder %s1536_s10, %s1796_s0  ;;  %p1264_p6 = scmp.lt.u32.totalorder %s1262_s6, %s1257_s17 }
  0x4c   : > { %p1260_p2 = pnand %p1259_p0, %p1258_p12  ;;  %p1266_p3 = scmp.lt.u32.totalorder %s1257_s17, %s1536_s10 }
  0x4d   : > { %p1265_p10 = por %p1264_p6, %p1263_p13 }
  0x4e   : > { %p1261_p1 = pneg %p1260_p2 }
  0x4f   : > { %p1267_p5 = por %p1266_p3, %p1265_p10 }
  0x51   : > { %p1268_p9 = pnand %p1267_p5, %p1261_p1 }
  0x53   : > { %1271 = shalt.err (!%p1268_p9)
}
  0x54   : > { %s1272_s30 = scalar_lea.vmem %s1538_s28, 512  ;;  %s1365_s11 = smov [#allocation2]  }
  0x55   : > { %p1273_p12 = scmp.ne.s32.totalorder %s1538_s28, %s1272_s30  ;;  %s1277_s23 = sshll.u32 %s1365_s11, 4  ;;  %s1278_s23 = int_to_ptr.vmem [resolvable:$false] %s1277_s23 }
  0x56   : > { %s1279_s7 = scalar_lea.vmem %s1278_s23, 1024  ;;  %p1280_p4 = scmp.lt.s32.totalorder %s1538_s28, %s1278_s23 }
  0x57   : > { %p1275_p2 = pnand %p1273_p12, %p1259_p0  ;;  %p1281_p13 = scmp.lt.s32.totalorder %s1279_s7, %s1272_s30 }
  0x59   : > { %p1276_p7 = pneg %p1275_p2  ;;  %p1282_p6 = por %p1281_p13, %p1280_p4 }
  0x5b   : > { %p1283_p10 = pnand %p1282_p6, %p1276_p7 }
  0x5d   : > { %1286 = shalt.err (!%p1283_p10)
}
  0x5e   : > { %1073 = dma.hbm_to_vmem [thread:$0]  (!%p1540_p11), %s1536_s10, 512, %s1538_s28, %s1544_s15, %s1363_s12, %s1363_s12, %s1364_s13  }
  0x5f   : > { %231 = sbr.rel (%p1440_p8) target bundleno = 648 (0x288), region = 40  ;;  %s1578_s17 = sand.u32 (!%p1440_p8), 1, %s1349_s19  }
  0x60   : > { %s963_s6 = sshll.u32 (!%p1440_p8), %s1578_s17, 5  ;;  %s234_s8 = scalar_lea.sflag (!%p1440_p8), [#allocation3], %s1578_s17 }
  0x61   : > { %s1582_s9 = scalar_lea.vmem (!%p1440_p8), [#allocation2], %s963_s6  ;;  %p1812_p4 = scmp.ne.s32.totalorder (!%p1440_p8), %s1805_s24, 0 }
  0x66   : > { %1332 = dma.done.wait (%p1812_p4), %s234_s8, 512  }
  0x67   : > { %1334 = vsyncadd (%p1812_p4), %s234_s8, 4294966784  ;;  %p1813_p7 = scmp.eq.s32.totalorder %s1421_s22, 0 }
  0x69   : > { %1336 = dma.done.wait (%p1813_p7), [#allocation6], 4096   ;;  %p1814_p8 = pmov %p1813_p7 }
  0x6a   : > { %v1366_v0 = vmov 0   ;;  %v1125_v1 = vld [vmem:[#allocation5 + $0x4] ss:$8 sps:$4 sm:$0xff]   ;;  %v1127_v2 = vld [vmem:[#allocation5] ss:$8 sps:$4 sm:$0xff]   ;;  %v1151_v19 = vld [vmem:[%s1582_s9 + $0x10] sm:$0xff]   ;;  %v301_v37 = vlaneseq }
  0x6b   : > { %1338 = vsyncadd (%p1814_p8), [#allocation6], 4294963200  ;;  %447 = vmatprep.mubr.bf16.mxu0 %v1366_v0  ;;  %415 = vmatprep.subr.bf16.mxu0 %v1125_v1  ;;  %v1128_v3 = vld [vmem:[#allocation5 + $0x14] ss:$8 sps:$4 sm:$0xff]   ;;  %v1130_v4 = vld [vmem:[#allocation5 + $0x10] ss:$8 sps:$4 sm:$0xff]  }
  0x6c   : > { %416 = vmatpush1.bf16.msra.mxu0 %v1127_v2  ;;  %v1131_v5 = vld [vmem:[#allocation5 + $0x24] ss:$8 sps:$4 sm:$0xff]   ;;  %v1133_v6 = vld [vmem:[#allocation5 + $0x20] ss:$8 sps:$4 sm:$0xff]   ;;  %v1134_v7 = vld [vmem:[#allocation5 + $0x34] ss:$8 sps:$4 sm:$0xff]  }
  0x6d   : > { %417 = vmatprep.subr.bf16.mxu0 %v1128_v3  ;;  %v1136_v8 = vld [vmem:[#allocation5 + $0x30] ss:$8 sps:$4 sm:$0xff]   ;;  %v1137_v9 = vld [vmem:[#allocation5 + $0x44] ss:$8 sps:$4 sm:$0xff]   ;;  %v1139_v10 = vld [vmem:[#allocation5 + $0x40] ss:$8 sps:$4 sm:$0xff]  }
  0x6e   : > { %v1140_v11 = vld [vmem:[#allocation5 + $0x54] ss:$8 sps:$4 sm:$0xff]   ;;  %v1142_v12 = vld [vmem:[#allocation5 + $0x50] ss:$8 sps:$4 sm:$0xff]   ;;  %v1143_v13 = vld [vmem:[#allocation5 + $0x64] ss:$8 sps:$4 sm:$0xff]  }
  0x6f   : > { %v1145_v14 = vld [vmem:[#allocation5 + $0x60] ss:$8 sps:$4 sm:$0xff]   ;;  %v1146_v15 = vld [vmem:[#allocation5 + $0x74] ss:$8 sps:$4 sm:$0xff]   ;;  %v1148_v16 = vld [vmem:[#allocation5 + $0x70] ss:$8 sps:$4 sm:$0xff]  }
  0x70   : > { %418 = vmatpush1.bf16.msra.mxu0 %v1130_v4  ;;  %v1149_v17 = vld [vmem:[%s1582_s9] sm:$0xff]   ;;  %v1150_v18 = vld [vmem:[%s1582_s9 + $0x8] sm:$0xff]   ;;  %v1152_v20 = vld [vmem:[%s1582_s9 + $0x18] sm:$0xff]   ;;  %v302_v38 = vshrl.u32 %v301_v37, 7  ;;  %s966_s12 = sshll.u32 %s1578_s17, 6  ;;  %s1010_s15 = sshll.u32 %s1421_s22, 10 }
  0x71   : > { %419 = vmatprep.subr.bf16.mxu0 %v1131_v5  ;;  %v1153_v21 = vld [vmem:[#allocation7 + $0x40] sm:$0xff]   ;;  %v1155_v23 = vld [vmem:[#allocation7 + $0x48] sm:$0xff]   ;;  %v1157_v25 = vld [vmem:[#allocation7 + $0x50] sm:$0xff]   ;;  %s1735_s28 = scalar_lea.vmem [#allocation8], %s966_s12  ;;  %s1750_s23 = scalar_lea.hbm %s1801_s5, %s1010_s15 }
  0x72   : > { %v1154_v22 = vld [vmem:[#allocation7] sm:$0xff]   ;;  %1011 = vmatprep.subr.bf16.mxu1 %v1153_v21  ;;  %v1156_v24 = vld [vmem:[#allocation7 + $0x8] sm:$0xff]   ;;  %v1158_v26 = vld [vmem:[#allocation7 + $0x10] sm:$0xff]   ;;  %v303_v39 = vsub.s32 0, %v302_v38  ;;  %v307_v41 = vsub.s32 1, %v302_v38  ;;  %s862_s14 = sshll.u32 %s1735_s28, 4  ;;  %s1745_s14 = int_to_ptr.vmem [resolvable:$true] %s862_s14 }
  0x73   : > { %1012 = vmatpush3.bf16.msra.mxu1 %v1154_v22  ;;  %v1159_v27 = vld [vmem:[#allocation7 + $0x58] sm:$0xff]   ;;  %v1161_v29 = vld [vmem:[#allocation7 + $0x60] sm:$0xff]   ;;  %v1163_v31 = vld [vmem:[#allocation7 + $0x68] sm:$0xff]   ;;  %s849_s7 = scalar_lea.sflag [#allocation4], %s1578_s17  ;;  %s1287_s6 = scalar_lea.vmem %s1745_s14, 1024 }
  0x74   : > { %420 = vmatpush1.bf16.msra.mxu0 %v1133_v6  ;;  %1013 = vmatprep.subr.bf16.mxu1 %v1155_v23  ;;  %v1160_v28 = vld [vmem:[#allocation7 + $0x18] sm:$0xff]   ;;  %v1162_v30 = vld [vmem:[#allocation7 + $0x20] sm:$0xff]   ;;  %v1164_v32 = vld [vmem:[#allocation7 + $0x28] sm:$0xff]   ;;  %p1288_p11 = scmp.ne.s32.totalorder %s1745_s14, %s1287_s6  ;;  %p1815_p0 = scmp.ne.s32.totalorder %s1810_s29, 0 }
  0x75   : > { %421 = vmatprep.subr.bf16.mxu0 %v1134_v7  ;;  %v1165_v33 = vld [vmem:[#allocation7 + $0x70] sm:$0xff]   ;;  %v1167_v35 = vld [vmem:[#allocation7 + $0x78] sm:$0xff]   ;;  %v299_v40 = vld [vmem:[%s1798_s2] sm:$0x3]  ;;  %s1367_s22 = smov [#allocation8]  }
  0x76   : > { %v1166_v34 = vld [vmem:[#allocation7 + $0x30] sm:$0xff]   ;;  %v1168_v36 = vld [vmem:[#allocation7 + $0x38] sm:$0xff]   ;;  %v1599_v42 = vrot.slane %v299_v40, %v303_v39  ;;  %v1601_v43 = vrot.slane %v299_v40, %v307_v41  ;;  %p1289_p1 = pnand %p1288_p11, %p1815_p0  ;;  %s1291_s8 = sshll.u32 %s1367_s22, 4  ;;  %s1292_s8 = int_to_ptr.vmem [resolvable:$false] %s1291_s8 }
  0x77   : > { %1014 = vmatpush3.bf16.msra.mxu1 %v1156_v24  ;;  %s1293_s9 = scalar_lea.vmem %s1292_s8, 2048  ;;  %p1294_p5 = scmp.lt.s32.totalorder %s1745_s14, %s1292_s8 }
  0x78   : > { %422 = vmatpush1.bf16.msra.mxu0 %v1136_v8  ;;  %1015 = vmatprep.subr.bf16.mxu1 %v1157_v25  ;;  %p1290_p3 = pneg %p1289_p1  ;;  %p1295_p9 = scmp.lt.s32.totalorder %s1293_s9, %s1287_s6 }
  0x79   : > { %423 = vmatprep.subr.bf16.mxu0 %v1137_v9 }
  0x7a   : > { %p1296_p12 = por %p1295_p9, %p1294_p5 }
  0x7b   : > { %1016 = vmatpush3.bf16.msra.mxu1 %v1158_v26 }
  0x7c   : > { %424 = vmatpush1.bf16.msra.mxu0 %v1139_v10  ;;  %1017 = vmatprep.subr.bf16.mxu1 %v1159_v27  ;;  %p1297_p2 = pnand %p1296_p12, %p1290_p3 }
  0x7d   : > { %425 = vmatprep.subr.bf16.mxu0 %v1140_v11 }
  0x7f   : > { %1018 = vmatpush3.bf16.msra.mxu1 %v1160_v28 }
  0x80   : > { %426 = vmatpush1.bf16.msra.mxu0 %v1142_v12  ;;  %1019 = vmatprep.subr.bf16.mxu1 %v1161_v29 }
  0x81   : > { %427 = vmatprep.subr.bf16.mxu0 %v1143_v13 }
  0x83   : > { %1020 = vmatpush3.bf16.msra.mxu1 %v1162_v30 }
  0x84   : > { %428 = vmatpush1.bf16.msra.mxu0 %v1145_v14  ;;  %1021 = vmatprep.subr.bf16.mxu1 %v1163_v31 }
  0x85   : > { %429 = vmatprep.subr.bf16.mxu0 %v1146_v15 }
  0x87   : > { %1022 = vmatpush3.bf16.msra.mxu1 %v1164_v32 }
  0x88   : > { %430 = vmatpush1.bf16.msra.mxu0 %v1148_v16  ;;  %1023 = vmatprep.subr.bf16.mxu1 %v1165_v33 }
  0x8b   : > { %448 = vmatmul.mubr.bf16.vlgmr.msra.gmra.mrb[0].mxu0 %v1149_v17  ;;  %1024 = vmatpush3.bf16.msra.mxu1 %v1166_v34 }
  0x8c   : > { %457 = vmatprep.mubr.bf16.mxu0 %v1366_v0  ;;  %1025 = vmatprep.subr.bf16.mxu1 %v1167_v35 }
  0x8f   : > { %1026 = vmatpush3.bf16.msra.mxu1 %v1168_v36 }
  0x93   : > { %458 = vmatmul.mubr.bf16.gmra.mrb[4].mxu0 %v1150_v18 }
  0x94   : > { %467 = vmatprep.mubr.bf16.mxu0 %v1366_v0 }
  0x9b   : > { %468 = vmatmul.mubr.bf16.gmra.mrb[8].mxu0 %v1151_v19 }
  0x9c   : > { %477 = vmatprep.mubr.bf16.mxu0 %v1366_v0 }
  0xa3   : > { %478 = vmatmul.mubr.bf16.gmra.mrb[12].mxu0 %v1152_v20 }
 0x15e   : > { %v449_v44 = vpop.f32.mrb[0].mxu0 }
 0x15f   : > { %v1604_v45 = vadd.f32 %v449_v44, %v1599_v42  ;;  %v451_v46 = vpop.f32.mrb[1].mxu0 }
 0x160   : > { %v1607_v47 = vadd.f32 %v451_v46, %v1601_v43  ;;  %v453_v48 = vpop.f32.mrb[2].mxu0 }
 0x161   : > { %v488_v49 = vmul.f32 %v1604_v45, %v1604_v45  ;;  %v1612_v50 = vadd.f32 %v453_v48, %v1599_v42  ;;  %v455_v51 = vpop.f32.mrb[3].mxu0 }
 0x162   : > { %v489_v52 = vmul.f32 %v1607_v47, %v1607_v47  ;;  %v1617_v53 = vadd.f32 %v455_v51, %v1601_v43 }
 0x163   : > { %v504_v54 = vmul.f32 %v488_v49, %v1604_v45  ;;  %v490_v55 = vmul.f32 %v1612_v50, %v1612_v50 }
 0x164   : > { %v505_v56 = vmul.f32 %v489_v52, %v1607_v47  ;;  %v491_v57 = vmul.f32 %v1617_v53, %v1617_v53 }
 0x165   : > { %v520_v58 = vmul.f32 0.044715, %v504_v54  ;;  %v506_v59 = vmul.f32 %v490_v55, %v1612_v50 }
 0x166   : > { %v521_v60 = vmul.f32 0.044715, %v505_v56  ;;  %v507_v61 = vmul.f32 %v491_v57, %v1617_v53  ;;  %v459_v62 = vpop.f32.mrb[4].mxu0 }
 0x167   : > { %v536_v63 = vadd.f32 %v520_v58, %v1604_v45  ;;  %v522_v0 = vmul.f32 0.044715, %v506_v59  ;;  %v1629_v1 = vadd.f32 %v459_v62, %v1599_v42  ;;  %v461_v2 = vpop.f32.mrb[5].mxu0 }
 0x168   : > { %v523_v3 = vmul.f32 0.044715, %v507_v61  ;;  %v1632_v4 = vadd.f32 %v461_v2, %v1601_v43  ;;  %v463_v5 = vpop.f32.mrb[6].mxu0  ;;  %v537_v6 = vadd.f32 %v521_v60, %v1607_v47 }
 0x169   : > { %v552_v7 = vmul.f32 0.7978846, %v536_v63  ;;  %v538_v8 = vadd.f32 %v522_v0, %v1612_v50  ;;  %v492_v9 = vmul.f32 %v1629_v1, %v1629_v1  ;;  %v1639_v10 = vadd.f32 %v463_v5, %v1599_v42  ;;  %v465_v11 = vpop.f32.mrb[7].mxu0 }
 0x16a   : > { %v493_v12 = vmul.f32 %v1632_v4, %v1632_v4  ;;  %v1644_v13 = vadd.f32 %v465_v11, %v1601_v43  ;;  %v539_v14 = vadd.f32 %v523_v3, %v1617_v53  ;;  %v553_v15 = vmul.f32 0.7978846, %v537_v6 }
 0x16b   : > { %1169 = vtanh.f32 %v552_v7  ;;  %v554_v16 = vmul.f32 0.7978846, %v538_v8  ;;  %v508_v17 = vmul.f32 %v492_v9, %v1629_v1  ;;  %v494_v18 = vmul.f32 %v1639_v10, %v1639_v10 }
 0x16c   : > { %v509_v19 = vmul.f32 %v493_v12, %v1632_v4  ;;  %v495_v20 = vmul.f32 %v1644_v13, %v1644_v13  ;;  %v555_v21 = vmul.f32 0.7978846, %v539_v14  ;;  %1171 = vtanh.f32 %v553_v15 }
 0x16d   : > { %1173 = vtanh.f32 %v554_v16  ;;  %v524_v22 = vmul.f32 0.044715, %v508_v17  ;;  %v510_v23 = vmul.f32 %v494_v18, %v1639_v10 }
 0x16e   : > { %v525_v24 = vmul.f32 0.044715, %v509_v19  ;;  %v511_v25 = vmul.f32 %v495_v20, %v1644_v13  ;;  %v469_v26 = vpop.f32.mrb[8].mxu0  ;;  %1175 = vtanh.f32 %v555_v21 }
 0x16f   : > { %v540_v27 = vadd.f32 %v524_v22, %v1629_v1  ;;  %v526_v28 = vmul.f32 0.044715, %v510_v23  ;;  %v1657_v29 = vadd.f32 %v469_v26, %v1599_v42  ;;  %v471_v30 = vpop.f32.mrb[9].mxu0 }
 0x170   : > { %v541_v31 = vadd.f32 %v525_v24, %v1632_v4  ;;  %v527_v32 = vmul.f32 0.044715, %v511_v25  ;;  %v1661_v33 = vadd.f32 %v471_v30, %v1601_v43  ;;  %v473_v34 = vpop.f32.mrb[10].mxu0 }
 0x171   : > { %v556_v35 = vmul.f32 0.7978846, %v540_v27  ;;  %v542_v36 = vadd.f32 %v526_v28, %v1639_v10  ;;  %v496_v37 = vmul.f32 %v1657_v29, %v1657_v29  ;;  %v1667_v38 = vadd.f32 %v473_v34, %v1599_v42  ;;  %v475_v39 = vpop.f32.mrb[11].mxu0 }
 0x172   : > { %v557_v40 = vmul.f32 0.7978846, %v541_v31  ;;  %v543_v41 = vadd.f32 %v527_v32, %v1644_v13  ;;  %v497_v44 = vmul.f32 %v1661_v33, %v1661_v33  ;;  %v1673_v46 = vadd.f32 %v475_v39, %v1601_v43 }
 0x173   : > { %1177 = vtanh.f32 %v556_v35  ;;  %v558_v48 = vmul.f32 0.7978846, %v542_v36  ;;  %v512_v49 = vmul.f32 %v496_v37, %v1657_v29  ;;  %v498_v51 = vmul.f32 %v1667_v38, %v1667_v38 }
 0x174   : > { %1179 = vtanh.f32 %v557_v40  ;;  %v559_v52 = vmul.f32 0.7978846, %v543_v41  ;;  %v513_v54 = vmul.f32 %v497_v44, %v1661_v33  ;;  %v499_v55 = vmul.f32 %v1673_v46, %v1673_v46 }
 0x175   : > { %v1170_v56 = vpop.eup %1169  ;;  %1181 = vtanh.f32 %v558_v48  ;;  %v528_v57 = vmul.f32 0.044715, %v512_v49  ;;  %v514_v58 = vmul.f32 %v498_v51, %v1667_v38 }
 0x176   : > { %v1172_v59 = vpop.eup %1171  ;;  %1183 = vtanh.f32 %v559_v52  ;;  %v529_v60 = vmul.f32 0.044715, %v513_v54  ;;  %v515_v61 = vmul.f32 %v499_v55, %v1673_v46  ;;  %v479_v62 = vpop.f32.mrb[12].mxu0  ;;  %v584_v63 = vadd.f32 1.0, %v1170_v56 }
 0x177   : > { %v1174_v0 = vpop.eup %1173  ;;  %v544_v2 = vadd.f32 %v528_v57, %v1657_v29  ;;  %v530_v3 = vmul.f32 0.044715, %v514_v58  ;;  %v1685_v5 = vadd.f32 %v479_v62, %v1599_v42  ;;  %v481_v6 = vpop.f32.mrb[13].mxu0  ;;  %v585_v7 = vadd.f32 1.0, %v1172_v59 }
 0x178   : > { %v545_v8 = vadd.f32 %v529_v60, %v1661_v33  ;;  %v531_v9 = vmul.f32 0.044715, %v515_v61  ;;  %v1689_v11 = vadd.f32 %v481_v6, %v1601_v43  ;;  %v483_v12 = vpop.f32.mrb[14].mxu0  ;;  %v586_v14 = vadd.f32 1.0, %v1174_v0  ;;  %v1176_v20 = vpop.eup %1175 }
 0x179   : > { %v560_v15 = vmul.f32 0.7978846, %v544_v2  ;;  %v546_v16 = vadd.f32 %v530_v3, %v1667_v38  ;;  %v500_v17 = vmul.f32 %v1685_v5, %v1685_v5  ;;  %v1695_v18 = vadd.f32 %v483_v12, %v1599_v42  ;;  %v485_v19 = vpop.f32.mrb[15].mxu0 }
 0x17a   : > { %v561_v21 = vmul.f32 0.7978846, %v545_v8  ;;  %v547_v22 = vadd.f32 %v531_v9, %v1673_v46  ;;  %v501_v23 = vmul.f32 %v1689_v11, %v1689_v11  ;;  %v1701_v24 = vadd.f32 %v485_v19, %v1601_v43 }
 0x17b   : > { %1185 = vtanh.f32 %v560_v15  ;;  %v562_v25 = vmul.f32 0.7978846, %v546_v16  ;;  %v516_v26 = vmul.f32 %v500_v17, %v1685_v5  ;;  %v502_v27 = vmul.f32 %v1695_v18, %v1695_v18 }
 0x17c   : > { %1187 = vtanh.f32 %v561_v21  ;;  %v563_v42 = vmul.f32 0.7978846, %v547_v22  ;;  %v517_v28 = vmul.f32 %v501_v23, %v1689_v11  ;;  %v503_v30 = vmul.f32 %v1701_v24, %v1701_v24 }
 0x17d   : > { %v1178_v31 = vpop.eup %1177  ;;  %1189 = vtanh.f32 %v562_v25  ;;  %v532_v32 = vmul.f32 0.044715, %v516_v26  ;;  %v518_v43 = vmul.f32 %v502_v27, %v1695_v18  ;;  %v587_v34 = vadd.f32 1.0, %v1176_v20 }
 0x17e   : > { %v1180_v35 = vpop.eup %1179  ;;  %1191 = vtanh.f32 %v563_v42  ;;  %v533_v36 = vmul.f32 0.044715, %v517_v28  ;;  %v519_v37 = vmul.f32 %v503_v30, %v1701_v24  ;;  %v601_v39 = vmul.f32 0.5, %v585_v7 }
 0x17f   : > { %v1182_v40 = vpop.eup %1181  ;;  %v548_v41 = vadd.f32 %v532_v32, %v1685_v5  ;;  %v534_v44 = vmul.f32 0.044715, %v518_v43  ;;  %v603_v48 = vmul.f32 0.5, %v587_v34  ;;  %v600_v49 = vmul.f32 0.5, %v584_v63 }
 0x180   : > { %v1184_v51 = vpop.eup %1183  ;;  %v549_v52 = vadd.f32 %v533_v36, %v1689_v11  ;;  %v535_v54 = vmul.f32 0.044715, %v519_v37  ;;  %v617_v55 = vmul.f32 %v601_v39, %v1607_v47  ;;  %v602_v56 = vmul.f32 0.5, %v586_v14 }
 0x181   : > { %v564_v57 = vmul.f32 0.7978846, %v548_v41  ;;  %v550_v58 = vadd.f32 %v534_v44, %v1695_v18  ;;  %v619_v59 = vmul.f32 %v603_v48, %v1617_v53  ;;  %v616_v60 = vmul.f32 %v600_v49, %v1604_v45 }
 0x182   : > { %v565_v61 = vmul.f32 0.7978846, %v549_v52  ;;  %v551_v62 = vadd.f32 %v535_v54, %v1701_v24  ;;  %v618_v0 = vmul.f32 %v602_v56, %v1612_v50  ;;  %v589_v63 = vadd.f32 1.0, %v1180_v35 }
 0x183   : > { %1193 = vtanh.f32 %v564_v57  ;;  %v566_v2 = vmul.f32 0.7978846, %v550_v58  ;;  %v633_v3 = vpack.c.bf16 %v619_v59, %v617_v55  ;;  %v591_v6 = vadd.f32 1.0, %v1184_v51  ;;  %v987_v59 = vld [vmem:[%s1800_s4] ss:$0 sm:$0xff] }
 0x184   : > { %1195 = vtanh.f32 %v565_v61  ;;  %v567_v47 = vmul.f32 0.7978846, %v551_v62  ;;  %v632_v7 = vpack.c.bf16 %v618_v0, %v616_v60  ;;  %v605_v8 = vmul.f32 0.5, %v589_v63 }
 0x185   : > { %v1186_v9 = vpop.eup %1185  ;;  %1197 = vtanh.f32 %v566_v2  ;;  %807 = vmatprep.mubr.bf16.mxu1 %v633_v3  ;;  %v607_v53 = vmul.f32 0.5, %v591_v6  ;;  %v588_v12 = vadd.f32 1.0, %v1178_v31  ;;  %v590_v45 = vadd.f32 1.0, %v1182_v40 }
 0x186   : > { %v1188_v14 = vpop.eup %1187  ;;  %1199 = vtanh.f32 %v567_v47  ;;  %808 = vmatmul.mubr.bf16.vlgmr.msra.gmra.mrb[0].mxu1 %v632_v7  ;;  %v621_v50 = vmul.f32 %v605_v8, %v1632_v4  ;;  %v592_v15 = vadd.f32 1.0, %v1186_v9 }
 0x187   : > { %v1190_v16 = vpop.eup %1189  ;;  %v623_v17 = vmul.f32 %v607_v53, %v1644_v13  ;;  %v604_v19 = vmul.f32 0.5, %v588_v12  ;;  %v606_v20 = vmul.f32 0.5, %v590_v45  ;;  %v593_v21 = vadd.f32 1.0, %v1188_v14 }
 0x188   : > { %v1192_v22 = vpop.eup %1191  ;;  %v594_v23 = vadd.f32 1.0, %v1190_v16  ;;  %v608_v25 = vmul.f32 0.5, %v592_v15 }
 0x189   : > { %v635_v26 = vpack.c.bf16 %v623_v17, %v621_v50  ;;  %v620_v27 = vmul.f32 %v604_v19, %v1629_v1  ;;  %v622_v42 = vmul.f32 %v606_v20, %v1639_v10  ;;  %v595_v28 = vadd.f32 1.0, %v1192_v22 }
 0x18a   : > { %v609_v30 = vmul.f32 0.5, %v593_v21  ;;  %v610_v31 = vmul.f32 0.5, %v594_v23  ;;  %v624_v43 = vmul.f32 %v608_v25, %v1657_v29 }
 0x18b   : > { %815 = vmatprep.mubr.bf16.mxu1 %v635_v26  ;;  %v634_v4 = vpack.c.bf16 %v622_v42, %v620_v27  ;;  %v611_v32 = vmul.f32 0.5, %v595_v28 }
 0x18c   : > { %v626_v13 = vmul.f32 %v610_v31, %v1667_v38  ;;  %v625_v35 = vmul.f32 %v609_v30, %v1661_v33 }
 0x18d   : > { %v1194_v34 = vpop.eup %1193  ;;  %v627_v36 = vmul.f32 %v611_v32, %v1673_v46 }
 0x18e   : > { %v1196_v37 = vpop.eup %1195  ;;  %816 = vmatmul.mubr.bf16.gmra.mrb[4].mxu1 %v634_v4  ;;  %v636_v1 = vpack.c.bf16 %v626_v13, %v624_v43  ;;  %v596_v39 = vadd.f32 1.0, %v1194_v34 }
 0x18f   : > { %v1198_v10 = vpop.eup %1197  ;;  %v637_v40 = vpack.c.bf16 %v627_v36, %v625_v35  ;;  %v597_v41 = vadd.f32 1.0, %v1196_v37 }
 0x190   : > { %v1200_v44 = vpop.eup %1199  ;;  %v598_v48 = vadd.f32 1.0, %v1198_v10  ;;  %v612_v49 = vmul.f32 0.5, %v596_v39 }
 0x191   : > { %823 = vmatprep.mubr.bf16.mxu1 %v637_v40  ;;  %v599_v29 = vadd.f32 1.0, %v1200_v44  ;;  %v613_v51 = vmul.f32 0.5, %v597_v41 }
 0x192   : > { %v614_v38 = vmul.f32 0.5, %v598_v48  ;;  %v628_v33 = vmul.f32 %v612_v49, %v1685_v5 }
 0x193   : > { %v615_v52 = vmul.f32 0.5, %v599_v29  ;;  %v629_v54 = vmul.f32 %v613_v51, %v1689_v11 }
 0x194   : > { %v630_v46 = vmul.f32 %v614_v38, %v1695_v18 }
 0x195   : > { %v631_v55 = vmul.f32 %v615_v52, %v1701_v24 }
 0x196   : > { %824 = vmatmul.mubr.bf16.gmra.mrb[8].mxu1 %v636_v1  ;;  %v638_v56 = vpack.c.bf16 %v630_v46, %v628_v33 }
 0x197   : > { %v639_v57 = vpack.c.bf16 %v631_v55, %v629_v54 }
 0x199   : > { %831 = vmatprep.mubr.bf16.mxu1 %v639_v57 }
 0x19e   : > { %832 = vmatmul.mubr.bf16.gmra.mrb[12].mxu1 %v638_v56 }
 0x259   : > { %v1027_v58 = vpop.f32.mrb[0].mxu1 }
 0x25a   : > { %v1028_v60 = vpop.f32.mrb[1].mxu1 }
 0x25b   : > { %v1029_v61 = vadd.f32 %v1028_v60, %v1027_v58  ;;  %v1030_v5 = vpop.f32.mrb[2].mxu1 }
 0x25c   : > { %v1031_v62 = vpop.f32.mrb[3].mxu1 }
 0x25d   : > { %v810_v18 = vadd.f32 %v1029_v61, %v987_v59  ;;  %v1032_v0 = vadd.f32 %v1031_v62, %v1030_v5 }
 0x25f   : > { %840 = vst [vmem:[%s1735_s28] sm:$0xff] %v810_v18  ;;  %v813_v11 = vadd.f32 %v1032_v0, %v987_v59 }
 0x261   : > { %841 = vst [vmem:[%s1735_s28 + $0x8] sm:$0xff] %v813_v11  ;;  %v1033_v24 = vpop.f32.mrb[4].mxu1 }
 0x262   : > { %v1034_v63 = vpop.f32.mrb[5].mxu1 }
 0x263   : > { %v1035_v2 = vadd.f32 %v1034_v63, %v1033_v24  ;;  %v1036_v3 = vpop.f32.mrb[6].mxu1 }
 0x264   : > { %v1037_v6 = vpop.f32.mrb[7].mxu1 }
 0x265   : > { %v818_v47 = vadd.f32 %v1035_v2, %v987_v59  ;;  %v1038_v7 = vadd.f32 %v1037_v6, %v1036_v3 }
 0x267   : > { %842 = vst [vmem:[%s1735_s28 + $0x10] sm:$0xff] %v818_v47  ;;  %v821_v8 = vadd.f32 %v1038_v7, %v987_v59 }
 0x269   : > { %843 = vst [vmem:[%s1735_s28 + $0x18] sm:$0xff] %v821_v8  ;;  %v1039_v9 = vpop.f32.mrb[8].mxu1 }
 0x26a   : > { %v1040_v53 = vpop.f32.mrb[9].mxu1 }
 0x26b   : > { %v1041_v12 = vadd.f32 %v1040_v53, %v1039_v9  ;;  %v1042_v45 = vpop.f32.mrb[10].mxu1 }
 0x26c   : > { %v1043_v14 = vpop.f32.mrb[11].mxu1 }
 0x26d   : > { %v826_v50 = vadd.f32 %v1041_v12, %v987_v59  ;;  %v1044_v15 = vadd.f32 %v1043_v14, %v1042_v45 }
 0x26f   : > { %844 = vst [vmem:[%s1735_s28 + $0x20] sm:$0xff] %v826_v50  ;;  %v829_v16 = vadd.f32 %v1044_v15, %v987_v59 }
 0x271   : > { %845 = vst [vmem:[%s1735_s28 + $0x28] sm:$0xff] %v829_v16  ;;  %v1045_v17 = vpop.f32.mrb[12].mxu1 }
 0x272   : > { %v1046_v19 = vpop.f32.mrb[13].mxu1 }
 0x273   : > { %v1047_v20 = vadd.f32 %v1046_v19, %v1045_v17  ;;  %v1048_v21 = vpop.f32.mrb[14].mxu1 }
 0x274   : > { %v1049_v22 = vpop.f32.mrb[15].mxu1 }
 0x275   : > { %v834_v23 = vadd.f32 %v1047_v20, %v987_v59  ;;  %v1050_v25 = vadd.f32 %v1049_v22, %v1048_v21 }
 0x277   : > { %846 = vst [vmem:[%s1735_s28 + $0x30] sm:$0xff] %v834_v23  ;;  %v837_v26 = vadd.f32 %v1050_v25, %v987_v59 }
 0x279   : > { %847 = vst [vmem:[%s1735_s28 + $0x38] sm:$0xff] %v837_v26 }
 0x27a   : > { %1300 = shalt.err (!%p1297_p2)
}
 0x27b   : > { %s1301_s24 = scalar_lea.hbm %s1750_s23, 1024  ;;  %s1305_s13 = scalar_lea.hbm %s1801_s5, 2048 }
 0x27c   : > { %p1302_p13 = scmp.ne.s32.totalorder %s1750_s23, %s1301_s24  ;;  %p1306_p4 = scmp.lt.u32.totalorder %s1750_s23, %s1801_s5 }
 0x27d   : > { %p1307_p7 = scmp.lt.u32.totalorder %s1305_s13, %s1301_s24  ;;  %p1309_p11 = scmp.lt.u32.totalorder %s1301_s24, %s1750_s23 }
 0x27e   : > { %p1303_p6 = pnand %p1302_p13, %p1815_p0 }
 0x27f   : > { %p1308_p8 = por %p1307_p7, %p1306_p4 }
 0x280   : > { %p1304_p10 = pneg %p1303_p6 }
 0x281   : > { %p1310_p1 = por %p1309_p11, %p1308_p8 }
 0x283   : > { %p1311_p3 = pnand %p1310_p1, %p1304_p10 }
 0x285   : > { %1314 = shalt.err (!%p1311_p3)
}
 0x286   : > { %s1368_s15 = smov 128   ;;  %s1369_s30 = smov 8  }
 0x287   : > { %1061 = dma.vmem_to_hbm [thread:$0]  (%p1815_p0), %s1745_s14, 1024, %s1750_s23, %s849_s7, %s1368_s15, %s1368_s15, %s1369_s30  }
 0x288 PF: > { %s877_s11 = sand.u32 1, %s1345_s18   ;;  %p1816_p5 = scmp.ne.s32.totalorder %s1806_s25, 0 }
 0x289   : > { %p1817_p9 = scmp.ge.s32.totalorder %s1357_s21, 2  ;;  %s878_s6 = scalar_lea.sflag [#allocation4], %s877_s11 }
 0x28b   : > { %p1075_p12 = pnand %p1817_p9, %p1816_p5 }
 0x28d   : > { %1340 = dma.done.wait (!%p1075_p12), %s878_s6, 1024  }
 0x28e   : > { %1342 = vsyncadd (!%p1075_p12), %s878_s6, 4294966272  ;;  %p19_p2 = scmp.ge.s32.totalorder %s1513_s16, 4   ;;  %s1818_s18 = smov %s1349_s19 }
 0x28f   : > { %s1819_s19 = smov %s1353_s20  ;;  %s1820_s20 = smov %s1522_s27 }
 0x290   : > { %s1821_s21 = smov %s1513_s16  ;;  %21 = sbr.rel (!%p19_p2) target bundleno = 6 (0x6), region = 93 }
 0x297   :  { %883 = vsyncpa [#allocation3], 1 }
 0x298   :  { %885 = vsyncpa [#allocation3 + $0x1], 1 }
 0x299   :  { %886 = vsyncpa [#allocation6], 1 }
 0x29a   :  { %887 = vsyncpa [#allocation4], 1 }
 0x29b   :  { %889 = vsyncpa [#allocation4 + $0x1], 1 }

</bundles_post_ra>
